<compile_context>
chip_gen: v5e
topology: v5e:2x2
jax: 0.10.0
libtpu: 0.0.40
codegen_flags: <defaults>
</compile_context>

<pallas_src>
import jax
import jax.numpy as jnp
from jax.experimental import pallas as pl
from jax.experimental.pallas import tpu as pltpu


def _round_up(x, m):
    return (x + m - 1) // m * m


def _vae_head_kernel(h_ref, w_ref, b_ref, eps_ref, ml_ref, z_ref):
    # One fused MXU pass: [mean | logvar] = h @ [W_mean | W_logvar] + [b_m | b_lv].
    ml = jnp.dot(h_ref[...], w_ref[...],
                 preferred_element_type=jnp.float32) + b_ref[...]       # (tm, 2L) f32
    ml_ref[...] = ml                                                    # lane-dense store

    # Build lane-dense duplicated slabs [mean|mean] and [logvar|logvar] with a
    # lane swap (slice + concat) + VPU selects, so the reparameterized z is also
    # a full-width, unmasked 128-lane store (the wrapper keeps z[:, :L]).
    two_l = ml.shape[-1]
    half = two_l // 2
    swapped = jnp.concatenate([ml[:, half:], ml[:, :half]], axis=-1)    # [logvar | mean]
    lane = jax.lax.broadcasted_iota(jnp.int32, ml.shape, 1)
    in_lo = lane < half
    mean_full = jnp.where(in_lo, ml, swapped)                           # [mean   | mean]
    logvar_full = jnp.where(in_lo, swapped, ml)                         # [logvar | logvar]

    # z = mean + eps * exp(0.5 * logvar)  (eps supplied by the wrapper).
    z_ref[...] = mean_full + eps_ref[...] * jnp.exp(0.5 * logvar_full)


def vae_encoder_head(hidden, w_head, b_head, eps, *, latent_dim):
    """hidden: (B, H) bf16; w_head: (H, 2L) bf16; b_head: (1, 2L) f32; eps: (B, L) f32."""
    B, H = hidden.shape
    L = latent_dim
    L2 = 2 * L
    assert w_head.shape == (H, L2) and b_head.shape == (1, L2)
    assert eps.shape == (B, L)
    assert L2 % 128 == 0, "fused head width must be lane-dense (multiple of 128)"

    # Pad batch to the sublane tile and pick the largest B-tile up to 256 rows
    # (amortizes the ~0.35 us per-step overhead at realistic batch sizes).
    tm = min(_round_up(B, 8), 256)
    B_pad = _round_up(B, tm)
    hidden = jnp.pad(hidden, ((0, B_pad - B), (0, 0)))
    eps_slab = jnp.pad(eps.astype(jnp.float32), ((0, B_pad - B), (0, L2 - L)))
    grid = (B_pad // tm,)

    ml_slab, z_slab = pl.pallas_call(
        _vae_head_kernel,
        out_shape=(
            jax.ShapeDtypeStruct((B_pad, L2), jnp.float32),   # [mean | logvar]
            jax.ShapeDtypeStruct((B_pad, L2), jnp.float32),   # [z    | z dup ]
        ),
        grid_spec=pltpu.PrefetchScalarGridSpec(
            num_scalar_prefetch=0,
            grid=grid,
            in_specs=[
                pl.BlockSpec((tm, H), lambda i: (i, 0)),      # hidden tile
                pl.BlockSpec((H, L2), lambda i: (0, 0)),      # resident fused weight
                pl.BlockSpec((1, L2), lambda i: (0, 0)),      # resident fused bias
                pl.BlockSpec((tm, L2), lambda i: (i, 0)),     # eps tile
            ],
            out_specs=[
                pl.BlockSpec((tm, L2), lambda i: (i, 0)),
                pl.BlockSpec((tm, L2), lambda i: (i, 0)),
            ],
        ),
        compiler_params=pltpu.CompilerParams(
            dimension_semantics=("parallel",),          # shard B-tiles across TCs (v7x)
            vmem_limit_bytes=32 * 1024 * 1024,          # explicit, safe on v7x 64 MiB
        ),
    )(hidden, w_head, b_head, eps_slab)

    mean = ml_slab[:B, :L]
    logvar = ml_slab[:B, L:]
    z = z_slab[:B, :L]
    return z, mean, logvar


def vae_encoder_forward(params, input_ids, eps):
    """Glue: stub base_model = embedding lookup; take last token hidden state."""
    last_ids = input_ids[:, -1]                    # (B,)
    hidden = params["embed"][last_ids]             # (B, H) bf16
    latent_dim = params["w_head"].shape[1] // 2
    return vae_encoder_head(hidden, params["w_head"], params["b_head"], eps,
                            latent_dim=latent_dim)


def init_params(key, vocab=50, hidden_size=32, latent_dim=64):
    k_e, k_wm, k_bm, k_wl, k_bl = jax.random.split(key, 5)
    scale = 1.0 / jnp.sqrt(hidden_size)
    w_mean = jax.random.uniform(k_wm, (hidden_size, latent_dim), jnp.float32, -scale, scale)
    w_logvar = jax.random.uniform(k_wl, (hidden_size, latent_dim), jnp.float32, -scale, scale)
    b_mean = jax.random.uniform(k_bm, (1, latent_dim), jnp.float32, -scale, scale)
    b_logvar = jax.random.uniform(k_bl, (1, latent_dim), jnp.float32, -scale, scale)
    return {
        # bf16 storage for embed + fused head weight (MXU-native); f32 bias/epilogue.
        "embed": (jax.random.normal(k_e, (vocab, hidden_size), jnp.float32) * 0.02
                  ).astype(jnp.bfloat16),
        "w_head": jnp.concatenate([w_mean, w_logvar], axis=1).astype(jnp.bfloat16),
        "b_head": jnp.concatenate([b_mean, b_logvar], axis=1),
    }


if __name__ == "__main__":
    B, S, V, H, L = 2, 8, 50, 32, 64

    key = jax.random.PRNGKey(0)
    k_params, k_ids, k_eps = jax.random.split(key, 3)

    params = init_params(k_params, vocab=V, hidden_size=H, latent_dim=L)
    input_ids = jax.random.randint(k_ids, (B, S), 0, V, dtype=jnp.int32)
    eps = jax.random.normal(k_eps, (B, L), dtype=jnp.float32)   # torch.randn_like(std)

    z, mean, logvar = vae_encoder_forward(params, input_ids, eps)
    jax.block_until_ready((z, mean, logvar))

    # Cross-check against a plain-JAX reference (same bf16 inputs, same eps).
    hidden_ref = params["embed"][input_ids[:, -1]].astype(jnp.float32)   # (B, H)
    w_ref = params["w_head"].astype(jnp.float32)
    ml_ref = hidden_ref @ w_ref + params["b_head"]
    mean_ref, logvar_ref = ml_ref[:, :L], ml_ref[:, L:]
    std_ref = jnp.exp(0.5 * logvar_ref)
    z_ref = mean_ref + eps * std_ref

    assert jnp.allclose(mean, mean_ref, atol=1e-4)
    assert jnp.allclose(logvar, logvar_ref, atol=1e-4)
    assert jnp.allclose(z, z_ref, atol=1e-4)
    assert bool(jnp.isfinite(z).all())

    print("KERNEL_OK")
</pallas_src>

<mosaic_0001>
module attributes {stable_mosaic.version = 11 : i64} {
  func.func @_vae_head_kernel(%arg0: i32, %arg1: memref<8x32xbf16, #tpu.memory_space<vmem>>, %arg2: memref<32x128xbf16, #tpu.memory_space<vmem>>, %arg3: memref<1x128xf32, #tpu.memory_space<vmem>>, %arg4: memref<8x128xf32, #tpu.memory_space<vmem>>, %arg5: memref<8x128xf32, #tpu.memory_space<vmem>>, %arg6: memref<8x128xf32, #tpu.memory_space<vmem>>) attributes {dimension_semantics = [#tpu.dimension_semantics<parallel>], iteration_bounds = array<i64: 1>, scalar_prefetch = 0 : i64, scratch_operands = 0 : i64, tpu.core_type = #tpu.core_type<tc>, window_params = [{transform_indices = @transform_0, window_bounds = array<i64: 8, 32>}, {pipeline_mode = #tpu.pipeline_mode<synchronous>, transform_indices = @transform_1, window_bounds = array<i64: 32, 128>}, {pipeline_mode = #tpu.pipeline_mode<synchronous>, transform_indices = @transform_2, window_bounds = array<i64: 1, 128>}, {transform_indices = @transform_3, window_bounds = array<i64: 8, 128>}, {transform_indices = @transform_4, window_bounds = array<i64: 8, 128>}, {transform_indices = @transform_5, window_bounds = array<i64: 8, 128>}]} {
    %c0 = arith.constant 0 : index
    %c0_0 = arith.constant 0 : index
    %0 = vector.load %arg1[%c0, %c0_0] : memref<8x32xbf16, #tpu.memory_space<vmem>>, vector<8x32xbf16>
    %c0_1 = arith.constant 0 : index
    %c0_2 = arith.constant 0 : index
    %1 = vector.load %arg2[%c0_1, %c0_2] : memref<32x128xbf16, #tpu.memory_space<vmem>>, vector<32x128xbf16>
    %cst = arith.constant dense<0.000000e+00> : vector<8x128xf32>
    %2 = tpu.matmul %0, %1, %cst {dimension_numbers = #tpu.dot_dimension_numbers<[1], [0], [0], [1], [0, 0, 1, 1], [], []>} : vector<8x32xbf16>, vector<32x128xbf16>, vector<8x128xf32> -> vector<8x128xf32>
    %c0_3 = arith.constant 0 : index
    %c0_4 = arith.constant 0 : index
    %3 = vector.load %arg3[%c0_3, %c0_4] : memref<1x128xf32, #tpu.memory_space<vmem>>, vector<1x128xf32>
    %4 = vector.broadcast %3 : vector<1x128xf32> to vector<8x128xf32>
    %5 = arith.addf %2, %4 : vector<8x128xf32>
    %c0_5 = arith.constant 0 : index
    %c0_6 = arith.constant 0 : index
    %6 = vector.load %arg5[%c0_5, %c0_6] : memref<8x128xf32, #tpu.memory_space<vmem>>, vector<8x128xf32>
    tpu.vector_store %arg5[%c0_5, %c0_6], %5 {strides = array<i32>} : memref<8x128xf32, #tpu.memory_space<vmem>>, vector<8x128xf32>,
    %7 = vector.extract_strided_slice %5 {offsets = [0, 64], sizes = [8, 64], strides = [1, 1]} : vector<8x128xf32> to vector<8x64xf32>
    %8 = vector.extract_strided_slice %5 {offsets = [0, 0], sizes = [8, 64], strides = [1, 1]} : vector<8x128xf32> to vector<8x64xf32>
    %9 = tpu.concatenate %7, %8 in 1 : vector<8x64xf32>, vector<8x64xf32> -> vector<8x128xf32>
    %10 = tpu.iota {dimensions = array<i32: 1>} : vector<8x128xi32>
    %c64_i32 = arith.constant 64 : i32
    %11 = vector.broadcast %c64_i32 : i32 to vector<8x128xi32>
    %12 = arith.cmpi slt, %10, %11 : vector<8x128xi32>
    %13 = arith.select %12, %5, %9 : vector<8x128xi1>, vector<8x128xf32>
    %14 = arith.select %12, %9, %5 : vector<8x128xi1>, vector<8x128xf32>
    %c0_7 = arith.constant 0 : index
    %c0_8 = arith.constant 0 : index
    %15 = vector.load %arg4[%c0_7, %c0_8] : memref<8x128xf32, #tpu.memory_space<vmem>>, vector<8x128xf32>
    %cst_9 = arith.constant 5.000000e-01 : f32
    %16 = vector.broadcast %cst_9 : f32 to vector<8x128xf32>
    %17 = arith.mulf %16, %14 : vector<8x128xf32>
    %18 = math.exp %17 : vector<8x128xf32>
    %19 = arith.mulf %15, %18 : vector<8x128xf32>
    %20 = arith.addf %13, %19 : vector<8x128xf32>
    %c0_10 = arith.constant 0 : index
    %c0_11 = arith.constant 0 : index
    %21 = vector.load %arg6[%c0_10, %c0_11] : memref<8x128xf32, #tpu.memory_space<vmem>>, vector<8x128xf32>
    tpu.vector_store %arg6[%c0_10, %c0_11], %20 {strides = array<i32>} : memref<8x128xf32, #tpu.memory_space<vmem>>, vector<8x128xf32>,
    return
  }
  func.func @transform_0(%arg0: i32) -> (i32, i32) {
    %c0_i32 = arith.constant 0 : i32
    %c0_i32_0 = arith.constant 0 : i32
    return %arg0, %c0_i32 : i32, i32
  }
  func.func @transform_1(%arg0: i32) -> (i32, i32) {
    %c0_i32 = arith.constant 0 : i32
    %c0_i32_0 = arith.constant 0 : i32
    %c0_i32_1 = arith.constant 0 : i32
    return %c0_i32, %c0_i32_0 : i32, i32
  }
  func.func @transform_2(%arg0: i32) -> (i32, i32) {
    %c0_i32 = arith.constant 0 : i32
    %c0_i32_0 = arith.constant 0 : i32
    %c0_i32_1 = arith.constant 0 : i32
    return %c0_i32, %c0_i32_0 : i32, i32
  }
  func.func @transform_3(%arg0: i32) -> (i32, i32) {
    %c0_i32 = arith.constant 0 : i32
    %c0_i32_0 = arith.constant 0 : i32
    return %arg0, %c0_i32 : i32, i32
  }
  func.func @transform_4(%arg0: i32) -> (i32, i32) {
    %c0_i32 = arith.constant 0 : i32
    %c0_i32_0 = arith.constant 0 : i32
    return %arg0, %c0_i32 : i32, i32
  }
  func.func @transform_5(%arg0: i32) -> (i32, i32) {
    %c0_i32 = arith.constant 0 : i32
    %c0_i32_0 = arith.constant 0 : i32
    return %arg0, %c0_i32 : i32, i32
  }
}

</mosaic_0001>

<bundles_post_ra>
// kernel: tpu_custom_call.1
= control target key start
LH: loop header
LB: loop body
LE: loop exit
PB: predicated region body
PF: predicated region fallthrough
CT: control target
= control target key end

     0   :  { %11 = vsyncpa [#allocation3], 0  ;;  %s358_s0 = inlined_call_operand.hbm [shape: bf16[8,32], index: 0, kind: input, shape index: {}]   ;;  %s359_s1 = inlined_call_operand.hbm [shape: bf16[32,128], index: 1, kind: input, shape index: {}]   ;;  %s360_s2 = inlined_call_operand.vmem [shape: f32[1,128], index: 2, kind: input, shape index: {}]   ;;  %s361_s3 = inlined_call_operand.hbm [shape: f32[8,128], index: 3, kind: input, shape index: {}]   ;;  %s362_s4 = inlined_call_operand.hbm [shape: f32[8,128], index: 4, kind: output, shape index: {0}]   ;;  %s363_s5 = inlined_call_operand.hbm [shape: f32[8,128], index: 5, kind: output, shape index: {1}]  }
   0x1   :  { %12 = vsyncpa [#allocation6], 0 }
   0x2   :  { %13 = vsyncpa [#allocation4], 0  ;;  %s30_s20 = sshll.u32 %s359_s1, 4  ;;  %s31_s20 = int_to_ptr.hbm [resolvable:$true] %s30_s20 }
   0x3   :  { %14 = vsyncpa [#allocation10], 0  ;;  %s303_s21 = smov [#allocation5]   ;;  %s20_s25 = sshll.u32 %s358_s0, 4  ;;  %s21_s25 = int_to_ptr.hbm [resolvable:$true] %s20_s25 }
   0x4   :  { %s32_s22 = sshll.u32 %s303_s21, 4  ;;  %s304_s26 = smov 64   ;;  %s33_s22 = int_to_ptr.vmem [resolvable:$true] %s32_s22 }
   0x5   :  { %s305_s27 = smov 4   ;;  %s306_s28 = smov [#allocation2]  }
   0x6   :  { %38 = dma.hbm_to_vmem [thread:$0]  %s31_s20, 256, %s33_s22, [#allocation6], %s304_s26, %s304_s26, %s305_s27  }
   0x7   :  { %s22_s29 = sshll.u32 %s306_s28, 4  ;;  %s46_s7 = sshll.u32 %s361_s3, 4  ;;  %s23_s29 = int_to_ptr.vmem [resolvable:$true] %s22_s29  ;;  %s47_s7 = int_to_ptr.hbm [resolvable:$true] %s46_s7 }
   0x8   :  { %25 = dma.hbm_to_vmem [thread:$0]  %s21_s25, 64, %s23_s29, [#allocation3]  }
   0x9   :  { %s307_s1 = smov [#allocation7]  }
   0xa   :  { %s48_s8 = sshll.u32 %s307_s1, 4  ;;  %s49_s8 = int_to_ptr.vmem [resolvable:$true] %s48_s8 }
   0xb   :  { %51 = dma.hbm_to_vmem [thread:$0]  %s47_s7, 128, %s49_s8, [#allocation6]  }
   0xc   :  { %295 = dma.done.wait [#allocation3], 64  }
   0xd   :  { %296 = vsyncadd [#allocation3], 4294967232 }
   0xe   :  { %297 = dma.done.wait [#allocation6], 384  }
   0xf   :  { %298 = vsyncadd [#allocation6], 4294966912  ;;  %v164_v0 = vld [vmem:[#allocation5 + $0x8] sm:$0xff]  ;;  %v163_v1 = vld [vmem:[#allocation5] sm:$0xff]  ;;  %vm86_vm0 = vcmask 261120   ;;  %s308_s9 = smov [#allocation8]   ;;  %v108_v7 = vlaneseq }
  0x10   :  { %96 = vmatpush.bf16.msra.mxu0 %v164_v0  ;;  %v65_v2 = vld [vmem:[#allocation2] sm:$0xf]  ;;  %s125_s10 = sshll.u32 %s308_s9, 4  ;;  %s127_s13 = sshll.u32 %s362_s4, 4  ;;  %v113_v13 = vld [vmem:[#allocation7] sm:$0xff]  ;;  %s126_s10 = int_to_ptr.vmem [resolvable:$true] %s125_s10  ;;  %s128_s13 = int_to_ptr.hbm [resolvable:$true] %s127_s13 }
  0x11   :  { %v172_v3 = vld [vmem:[%s360_s2] ss:$0 sm:$0xff]  ;;  %v109_v8 = vand.u32 127, %v108_v7  ;;  %s309_s2 = smov [#allocation9]   ;;  %s138_s4 = sshll.u32 %s363_s5, 4  ;;  %s139_s4 = int_to_ptr.hbm [resolvable:$true] %s138_s4 }
  0x12   :  { %s136_s14 = sshll.u32 %s309_s2, 4  ;;  %s137_s14 = int_to_ptr.vmem [resolvable:$true] %s136_s14 }
  0x13   :  { %vm110_vm1 = vcmp.lt.s32.totalorder %v109_v8, 64 }
  0x14   :  { %97 = vmatpush.bf16.msra.mxu0 %v163_v1 }
  0x17   :  { %162 = vmatmul.msk.bf16.vlgmr.msra.gmra.mxu0 %vm86_vm0, %v65_v2 }
  0x94   :  { %v99_v4 = vpop.f32.mrf.mxu0 }
  0x95   :  { %v100_v5 = vadd.f32 %v172_v3, %v99_v4 }
  0x97   :  { %103 = vst [vmem:[#allocation8] sm:$0xff] %v100_v5  ;;  %105 = vrot.lane.b32.xlu0 %v100_v5, %s304_s26 }
  0x98   :  { %130 = dma.vmem_to_hbm [thread:$0]  %s126_s10, 128, %s128_s13, [#allocation4]  }
  0x9c   :  { %v101_v6 = vpop.f32.mrf.mxu0 }
 0x109   :  { %v106_v9 = vpop.permute.xlu0 %105 }
 0x10a   :  { %v112_v10 = vsel %vm110_vm1, %v106_v9, %v100_v5  ;;  %v111_v16 = vsel %vm110_vm1, %v100_v5, %v106_v9 }
 0x10b   :  { %v114_v11 = vmul.f32 0.5, %v112_v10 }
 0x10d   :  { %v115_v12 = vmul.f32 1.442695, %v114_v11 }
 0x10f   :  { %173 = vpow2.f32 %v115_v12 }
 0x115   :  { %v174_v14 = vpop.eup %173 }
 0x116   :  { %v117_v15 = vmul.f32 %v174_v14, %v113_v13 }
 0x118   :  { %v118_v17 = vadd.f32 %v117_v15, %v111_v16 }
 0x11a   :  { %119 = vst [vmem:[#allocation9] sm:$0xff] %v118_v17 }
 0x11b   :  { %141 = dma.vmem_to_hbm [thread:$0]  %s137_s14, 128, %s139_s4, [#allocation10]  }
 0x11c   :  { %299 = dma.done.wait [#allocation4], 128  }
 0x11d   :  { %300 = vsyncadd [#allocation4], 4294967168 }
 0x11e   :  { %301 = dma.done.wait [#allocation10], 128  }
 0x11f   :  { %302 = vsyncadd [#allocation10], 4294967168 }
 0x120   :  { %150 = vsyncpa [#allocation3], 1 }
 0x121   :  { %151 = vsyncpa [#allocation6], 1 }
 0x122   :  { %152 = vsyncpa [#allocation4], 1 }
 0x123   :  { %153 = vsyncpa [#allocation10], 1 }

</bundles_post_ra>
